<compile_context>
chip_gen: v6e
topology: v6e:2x2x1
jax: 0.10.0
libtpu: 0.0.40
codegen_flags: <defaults>
</compile_context>

<pallas_src>
import functools
import math

import jax
import jax.numpy as jnp
from jax import lax
from jax.experimental import pallas as pl
from jax.experimental.pallas import tpu as pltpu

_LANE = 128
_SUBLANE = 8
_K_CAP = 512                      # max n_dim chunk (sublane rows) per block
_TARGET_BLOCK_BYTES = 4 << 20     # ~4 MiB (sublane-padded) per input buffer
_VMEM_LIMIT_BYTES = 32 << 20      # safe on v5e / v6e / v7x


def _round_up(v: int, m: int) -> int:
    return ((v + m - 1) // m) * m


def _round_down(v: int, m: int) -> int:
    return (v // m) * m


def _ackley_kernel(x_ref, o_ref, s1_ref, s2_ref, *, a, b, c, n_dim, tile_k,
                   need_mask):
    # x_ref : (tile_k, tile_b) chunk of coords (batch on lanes)
    # o_ref : (1, tile_b) lane-dense energy row (resident across k axis)
    # s1/s2 : (1, tile_b) f32 accumulators for sum(x^2) / sum(cos(c*x))
    k = pl.program_id(1)

    @pl.when(k == 0)
    def _():
        s1_ref[...] = jnp.zeros_like(s1_ref)
        s2_ref[...] = jnp.zeros_like(s2_ref)

    x = x_ref[...].astype(jnp.float32)            # compute in f32
    sq = x * x
    cs = jnp.cos(c * x)
    if need_mask:
        # Last n_dim chunk overhangs the array: zero out invalid sublane rows.
        row = lax.broadcasted_iota(jnp.int32, x.shape, 0) + k * tile_k
        valid = row < n_dim
        sq = jnp.where(valid, sq, 0.0)
        cs = jnp.where(valid, cs, 0.0)
    s1_ref[...] += jnp.sum(sq, axis=0, keepdims=True)
    s2_ref[...] += jnp.sum(cs, axis=0, keepdims=True)

    @pl.when(k == pl.num_programs(1) - 1)
    def _():
        inv_n = 1.0 / float(n_dim)
        term1 = -a * jnp.exp(-b * jnp.sqrt(s1_ref[...] * inv_n))
        term2 = -jnp.exp(s2_ref[...] * inv_n)
        o_ref[...] = (term1 + term2 + (a + math.e)).astype(o_ref.dtype)


def ackley_energy(x, a: float = 20.0, b: float = 0.2,
                  c: float = 2.0 * math.pi):
    """Pallas TPU implementation of AckleyEnergy.forward.

    x: array of shape (..., n). Returns array of shape (...), dtype of x.
    """
    assert x.ndim >= 1, "x must have at least one (coordinate) dimension"
    n_dim = x.shape[-1]
    assert n_dim >= 1, "coordinate dimension must be non-empty"
    lead_shape = x.shape[:-1]
    batch = 1
    for d in lead_shape:
        batch *= d
    if batch == 0:
        return jnp.zeros(lead_shape, dtype=x.dtype)

    # Flatten leading dims and put the batch on the lane (fast) axis.
    # TODO(synk): accept a pre-transposed (n_dim, batch) input (or fuse the
    # transpose into the upstream producer) to remove this extra HBM copy.
    x2 = jnp.swapaxes(x.reshape(batch, n_dim), 0, 1)          # (n_dim, batch)

    # Pad the batch axis only to a lane multiple (<=127 cols, usually a no-op
    # and fused by XLA with the transpose copy). Partial *tile* overhang is
    # handled by the pipeline's bounded DMAs, not by padding to a tile
    # multiple. Zero padding is harmless: padded lanes are sliced off.
    n_pad = _round_up(batch, _LANE)
    if n_pad != batch:
        x2 = jnp.pad(x2, ((0, 0), (0, n_pad - batch)))

    # --- adaptive tiling ---
    # Chunk n_dim so block height stays bounded; size the lane tile so each
    # (sublane-padded) input block is ~_TARGET_BLOCK_BYTES.
    tile_k = n_dim if n_dim <= _K_CAP else _K_CAP
    padded_k = _round_up(tile_k, _SUBLANE)            # VMEM sublane padding
    bytes_per_col = padded_k * 4                      # conservative (f32)
    tile_b = _round_down(_TARGET_BLOCK_BYTES // bytes_per_col, _LANE)
    tile_b = max(tile_b, _LANE)
    tile_b = min(tile_b, n_pad)

    num_b = pl.cdiv(n_pad, tile_b)
    num_k = (n_dim + tile_k - 1) // tile_k
    need_mask = (n_dim % tile_k) != 0

    kernel = functools.partial(
        _ackley_kernel, a=float(a), b=float(b), c=float(c),
        n_dim=n_dim, tile_k=tile_k, need_mask=need_mask)

    out = pl.pallas_call(
        kernel,
        out_shape=jax.ShapeDtypeStruct((1, n_pad), x.dtype),
        grid_spec=pltpu.PrefetchScalarGridSpec(
            num_scalar_prefetch=0,
            grid=(num_b, num_k),                      # k (reduction) innermost
            in_specs=[pl.BlockSpec((tile_k, tile_b), lambda i, k: (k, i))],
            out_specs=pl.BlockSpec((1, tile_b), lambda i, k: (0, i)),
            scratch_shapes=[pltpu.VMEM((1, tile_b), jnp.float32),
                            pltpu.VMEM((1, tile_b), jnp.float32)],
        ),
        compiler_params=pltpu.CompilerParams(
            dimension_semantics=("parallel", "arbitrary"),
            vmem_limit_bytes=_VMEM_LIMIT_BYTES,
        ),
    )(x2)

    return out[0, :batch].reshape(lead_shape)


def _reference(x, a=20.0, b=0.2, c=2.0 * math.pi):
    n = x.shape[-1]
    xf = x.astype(jnp.float32)
    sum1 = jnp.sum(xf ** 2, axis=-1)
    sum2 = jnp.sum(jnp.cos(c * xf), axis=-1)
    term1 = -a * jnp.exp(-b * jnp.sqrt(sum1 / n))
    term2 = -jnp.exp(sum2 / n)
    return (term1 + term2 + a + math.e).astype(x.dtype)


# TODO(synk): gradient() relies on torch.autograd; only forward() is implemented here.

if __name__ == "__main__":
    key = jax.random.PRNGKey(0)
    # (..., n) input — a (2, 4, 16) batch of points in 16-D Ackley space.
    x = jax.random.normal(key, (2, 4, 16, 16), dtype=jnp.float32)

    energy = ackley_energy(x)
    jax.block_until_ready(energy)

    ref = _reference(x)
    assert energy.shape == ref.shape == (2, 4, 16)
    assert jnp.allclose(energy, ref, rtol=1e-5, atol=1e-5)

    print("KERNEL_OK")
</pallas_src>

<mosaic_0001>
module attributes {stable_mosaic.version = 11 : i64} {
  func.func @_ackley_kernel(%arg0: i32, %arg1: i32, %arg2: memref<16x128xf32, #tpu.memory_space<vmem>>, %arg3: memref<1x128xf32, #tpu.memory_space<vmem>>, %arg4: memref<1x128xf32, #tpu.memory_space<vmem>>, %arg5: memref<1x128xf32, #tpu.memory_space<vmem>>) attributes {dimension_semantics = [#tpu.dimension_semantics<parallel>, #tpu.dimension_semantics<arbitrary>], iteration_bounds = array<i64: 1, 1>, scalar_prefetch = 0 : i64, scratch_operands = 2 : i64, tpu.core_type = #tpu.core_type<tc>, window_params = [{transform_indices = @transform_0, window_bounds = array<i64: 16, 128>}, {transform_indices = @transform_1, window_bounds = array<i64: 1, 128>}]} {
    %c0_i32 = arith.constant 0 : i32
    %0 = arith.cmpi eq, %arg1, %c0_i32 : i32
    %1 = arith.extui %0 : i1 to i32
    %c0_i32_0 = arith.constant 0 : i32
    %2 = arith.cmpi ne, %1, %c0_i32_0 : i32
    scf.if %2 {
      %cst_14 = arith.constant 0.000000e+00 : f32
      %21 = vector.broadcast %cst_14 : f32 to vector<1x128xf32>
      %c0_15 = arith.constant 0 : index
      %c0_16 = arith.constant 0 : index
      %22 = vector.load %arg4[%c0_15, %c0_16] : memref<1x128xf32, #tpu.memory_space<vmem>>, vector<1x128xf32>
      tpu.vector_store %arg4[%c0_15, %c0_16], %21 {strides = array<i32>} : memref<1x128xf32, #tpu.memory_space<vmem>>, vector<1x128xf32>,
      %cst_17 = arith.constant 0.000000e+00 : f32
      %23 = vector.broadcast %cst_17 : f32 to vector<1x128xf32>
      %c0_18 = arith.constant 0 : index
      %c0_19 = arith.constant 0 : index
      %24 = vector.load %arg5[%c0_18, %c0_19] : memref<1x128xf32, #tpu.memory_space<vmem>>, vector<1x128xf32>
      tpu.vector_store %arg5[%c0_18, %c0_19], %23 {strides = array<i32>} : memref<1x128xf32, #tpu.memory_space<vmem>>, vector<1x128xf32>,
    } else {
    }
    %c0 = arith.constant 0 : index
    %c0_1 = arith.constant 0 : index
    %3 = vector.load %arg2[%c0, %c0_1] : memref<16x128xf32, #tpu.memory_space<vmem>>, vector<16x128xf32>
    %4 = arith.mulf %3, %3 : vector<16x128xf32>
    %cst = arith.constant 6.28318548 : f32
    %5 = vector.broadcast %cst : f32 to vector<16x128xf32>
    %6 = arith.mulf %5, %3 : vector<16x128xf32>
    %7 = math.cos %6 : vector<16x128xf32>
    %c0_2 = arith.constant 0 : index
    %c0_3 = arith.constant 0 : index
    %8 = vector.load %arg4[%c0_2, %c0_3] : memref<1x128xf32, #tpu.memory_space<vmem>>, vector<1x128xf32>
    %cst_4 = arith.constant dense<0.000000e+00> : vector<128xf32>
    %9 = vector.multi_reduction <add>, %4, %cst_4 [0] : vector<16x128xf32> to vector<128xf32>
    %10 = vector.shape_cast %9 : vector<128xf32> to vector<1x128xf32>
    %11 = arith.addf %8, %10 : vector<1x128xf32>
    %c0_5 = arith.constant 0 : index
    %c0_6 = arith.constant 0 : index
    %12 = vector.load %arg4[%c0_5, %c0_6] : memref<1x128xf32, #tpu.memory_space<vmem>>, vector<1x128xf32>
    tpu.vector_store %arg4[%c0_5, %c0_6], %11 {strides = array<i32>} : memref<1x128xf32, #tpu.memory_space<vmem>>, vector<1x128xf32>,
    %c0_7 = arith.constant 0 : index
    %c0_8 = arith.constant 0 : index
    %13 = vector.load %arg5[%c0_7, %c0_8] : memref<1x128xf32, #tpu.memory_space<vmem>>, vector<1x128xf32>
    %cst_9 = arith.constant dense<0.000000e+00> : vector<128xf32>
    %14 = vector.multi_reduction <add>, %7, %cst_9 [0] : vector<16x128xf32> to vector<128xf32>
    %15 = vector.shape_cast %14 : vector<128xf32> to vector<1x128xf32>
    %16 = arith.addf %13, %15 : vector<1x128xf32>
    %c0_10 = arith.constant 0 : index
    %c0_11 = arith.constant 0 : index
    %17 = vector.load %arg5[%c0_10, %c0_11] : memref<1x128xf32, #tpu.memory_space<vmem>>, vector<1x128xf32>
    tpu.vector_store %arg5[%c0_10, %c0_11], %16 {strides = array<i32>} : memref<1x128xf32, #tpu.memory_space<vmem>>, vector<1x128xf32>,
    %c0_i32_12 = arith.constant 0 : i32
    %18 = arith.cmpi eq, %arg1, %c0_i32_12 : i32
    %19 = arith.extui %18 : i1 to i32
    %c0_i32_13 = arith.constant 0 : i32
    %20 = arith.cmpi ne, %19, %c0_i32_13 : i32
    scf.if %20 {
      %c0_14 = arith.constant 0 : index
      %c0_15 = arith.constant 0 : index
      %21 = vector.load %arg4[%c0_14, %c0_15] : memref<1x128xf32, #tpu.memory_space<vmem>>, vector<1x128xf32>
      %cst_16 = arith.constant 6.250000e-02 : f32
      %22 = vector.broadcast %cst_16 : f32 to vector<1x128xf32>
      %23 = arith.mulf %21, %22 : vector<1x128xf32>
      %24 = math.sqrt %23 : vector<1x128xf32>
      %cst_17 = arith.constant -2.000000e-01 : f32
      %25 = vector.broadcast %cst_17 : f32 to vector<1x128xf32>
      %26 = arith.mulf %25, %24 : vector<1x128xf32>
      %27 = math.exp %26 : vector<1x128xf32>
      %cst_18 = arith.constant -2.000000e+01 : f32
      %28 = vector.broadcast %cst_18 : f32 to vector<1x128xf32>
      %29 = arith.mulf %28, %27 : vector<1x128xf32>
      %c0_19 = arith.constant 0 : index
      %c0_20 = arith.constant 0 : index
      %30 = vector.load %arg5[%c0_19, %c0_20] : memref<1x128xf32, #tpu.memory_space<vmem>>, vector<1x128xf32>
      %cst_21 = arith.constant 6.250000e-02 : f32
      %31 = vector.broadcast %cst_21 : f32 to vector<1x128xf32>
      %32 = arith.mulf %30, %31 : vector<1x128xf32>
      %33 = math.exp %32 : vector<1x128xf32>
      %cst_22 = arith.constant 0.000000e+00 : f32
      %34 = vector.broadcast %cst_22 : f32 to vector<1x128xf32>
      %35 = arith.subf %34, %33 : vector<1x128xf32>
      %36 = arith.addf %29, %35 : vector<1x128xf32>
      %cst_23 = arith.constant 22.7182827 : f32
      %37 = vector.broadcast %cst_23 : f32 to vector<1x128xf32>
      %38 = arith.addf %36, %37 : vector<1x128xf32>
      %c0_24 = arith.constant 0 : index
      %c0_25 = arith.constant 0 : index
      %39 = vector.load %arg3[%c0_24, %c0_25] : memref<1x128xf32, #tpu.memory_space<vmem>>, vector<1x128xf32>
      tpu.vector_store %arg3[%c0_24, %c0_25], %38 {strides = array<i32>} : memref<1x128xf32, #tpu.memory_space<vmem>>, vector<1x128xf32>,
    } else {
    }
    return
  }
  func.func @transform_0(%arg0: i32, %arg1: i32) -> (i32, i32) {
    %c0_i32 = arith.constant 0 : i32
    return %arg1, %arg0 : i32, i32
  }
  func.func @transform_1(%arg0: i32, %arg1: i32) -> (i32, i32) {
    %c0_i32 = arith.constant 0 : i32
    %c0_i32_0 = arith.constant 0 : i32
    return %c0_i32, %arg0 : i32, i32
  }
}

</mosaic_0001>

<bundles_post_ra>
// kernel: tpu_custom_call.1
= control target key start
LH: loop header
LB: loop body
LE: loop exit
PB: predicated region body
PF: predicated region fallthrough
CT: control target
= control target key end

     0   :  { %6 = vsyncpa [#allocation5], 0  ;;  %s506_s0 = inlined_call_operand.hbm [shape: f32[16,128], index: 0, kind: input, shape index: {}]   ;;  %s507_s1 = inlined_call_operand.hbm [shape: f32[1,128], index: 1, kind: output, shape index: {}]  }
   0x1   :  { %7 = vsyncpa [#allocation6], 0  ;;  %s385_s6 = smov [#allocation4]  }
   0x2   :  { %s13_s7 = sshll.u32 %s385_s6, 4  ;;  %s14_s7 = int_to_ptr.vmem [resolvable:$true] %s13_s7 }
   0x3   :  { %s349_s8 = scalar_lea.vmem %s14_s7, 256  ;;  %p354_p1 = scmp.lt.s32.totalorder %s14_s7, %s14_s7 }
   0x4   :  { %p350_p0 = scmp.ne.s32.totalorder %s14_s7, %s349_s8  ;;  %p355_p2 = scmp.lt.s32.totalorder %s349_s8, %s349_s8 }
   0x6   :  { %p356_p3 = por %p355_p2, %p354_p1 }
   0x8   :  { %p357_p4 = pnand %p356_p3, %p350_p0 }
   0xa   :  { %360 = shalt.err (!%p357_p4)
}
   0xb   :  { %s386_s9 = smov 128   ;;  %s387_s10 = smov 8  }
   0xc   :  { %19 = dma.hbm_to_vmem [thread:$0]  %s506_s0, 256, %s14_s7, [#allocation5], %s386_s9, %s386_s9, %s387_s10  }
   0xd   :  { %381 = dma.done.wait [#allocation5], 256  }
   0xe   :  { %382 = vsyncadd [#allocation5], 4294967040  ;;  %v388_v0 = vmov 0.0   ;;  %v29_v1 = vld [vmem:[#allocation4] sm:$0xff]  ;;  %v30_v2 = vld [vmem:[#allocation4 + $0x8] sm:$0xff]  ;;  %s395_s0 = smov [#allocation7]  }
   0xf   :  { %27 = vst [vmem:[#allocation2] sm:$0x1] %v388_v0  ;;  %28 = vst [vmem:[#allocation3] sm:$0x1] %v388_v0  ;;  %v31_v3 = vmul.f32 %v29_v1, %v29_v1  ;;  %v32_v4 = vmul.f32 %v30_v2, %v30_v2  ;;  %v409_v5 = vmul.f32 6.2831855, %v29_v1 }
  0x10   :  { %v411_v6 = vmul.f32 6.2831855, %v30_v2  ;;  %v389_v37 = vmov 683565275   ;;  %v390_v39 = vmov 2475754826  }
  0x11   :  { %v38_v7 = vand.u32 2139095040, %v409_v5  ;;  %v242_v9 = vadd.f32 %v32_v4, %v31_v3  ;;  %v35_v10 = vand.u32 2147483647, %v409_v5  ;;  %v391_v42 = vmov 2131351028   ;;  %s291_s13 = sshll.u32 %s395_s0, 4  ;;  %s292_s13 = int_to_ptr.vmem [resolvable:$true] %s291_s13 }
  0x12   :  { %v141_v8 = vand.u32 2139095040, %v411_v6  ;;  %v138_v11 = vand.u32 2147483647, %v411_v6  ;;  %v392_v44 = vmov 2102212464   ;;  %vm37_vm14 = vcmp.lt.s32.totalorder %v409_v5, 0  ;;  %p366_p6 = scmp.lt.s32.totalorder %s292_s13, %s292_s13 }
  0x13   :  { %v39_v12 = vshrl.u32 %v38_v7, 23  ;;  %v243_v14 = vrot.slane %v242_v9, 4  ;;  %v42_v15 = vand.u32 8388607, %v35_v10  ;;  %v393_v46 = vmov 920167782  }
  0x14   :  { %v142_v13 = vshrl.u32 %v141_v8, 23  ;;  %v145_v16 = vand.u32 8388607, %v138_v11  ;;  %v394_v54 = vmov 1326507024   ;;  %s361_s14 = scalar_lea.vmem %s292_s13, 16 }
  0x15   :  { %v300_v17 = vadd.s32 4294967169, %v39_v12  ;;  %v244_v19 = vadd.f32 %v243_v14, %v242_v9  ;;  %v43_v23 = vor.u32 8388608, %v42_v15  ;;  %vm474_vm15 = vcmp.le.f32.partialorder %v35_v10, 0.7853982  ;;  %p362_p5 = scmp.ne.s32.totalorder %s292_s13, %s361_s14  ;;  %s365_s15 = scalar_lea.vmem %s292_s13, 32 }
  0x16   :  { %v304_v18 = vadd.s32 4294967169, %v142_v13  ;;  %v146_v24 = vor.u32 8388608, %v145_v16  ;;  %v241_v36 = vld [vmem:[#allocation2] sm:$0x1]  ;;  %p367_p7 = scmp.lt.s32.totalorder %s365_s15, %s361_s14 }
  0x17   :  { %v45_v20 = vadd.s32 1, %v300_v17  ;;  %v245_v22 = vrot.slane %v244_v19, 2  ;;  %v423_v32 = vshll.u32 %v43_v23, 8 }
  0x18   :  { %v148_v21 = vadd.s32 1, %v304_v18  ;;  %v425_v33 = vshll.u32 %v146_v24, 8  ;;  %p368_p8 = por %p367_p7, %p366_p6 }
  0x19   :  { %vm46_vm0 = vcmp.gt.s32.totalorder %v45_v20, 0  ;;  %v246_v25 = vadd.f32 %v245_v22, %v244_v19 }
  0x1a   :  { %vm149_vm1 = vcmp.gt.s32.totalorder %v148_v21, 0  ;;  %v47_v26 = vsel %vm46_vm0, %v45_v20, 0  ;;  %vm140_vm0 = vcmp.lt.s32.totalorder %v411_v6, 0  ;;  %p369_p9 = pnand %p368_p8, %p362_p5 }
  0x1b   :  { %v150_v27 = vsel %vm149_vm1, %v148_v21, 0  ;;  %v49_v28 = vand.u32 31, %v47_v26  ;;  %v48_v30 = vshrl.u32 %v47_v26, 5  ;;  %v247_v31 = vrot.slane %v246_v25, 1 }
  0x1c   :  { %v421_v29 = vand.u32 31, %v150_v27  ;;  %v151_v1 = vshrl.u32 %v150_v27, 5  ;;  %vm487_vm1 = vcmp.le.f32.partialorder %v138_v11, 0.7853982 }
  0x1d   :  { %v50_v34 = vsub.s32 32, %v49_v28  ;;  %v52_v38 = vshll.u32 %v389_v37, %v49_v28  ;;  %v55_v40 = vshll.u32 %v390_v39, %v49_v28  ;;  %v248_v41 = vadd.f32 %v247_v31, %v246_v25 }
  0x1e   :  { %v153_v35 = vsub.s32 32, %v421_v29  ;;  %v58_v43 = vshll.u32 %v391_v42, %v49_v28  ;;  %v61_v45 = vshll.u32 %v392_v44, %v49_v28  ;;  %v64_v47 = vshll.u32 %v393_v46, %v49_v28 }
  0x1f   :  { %v51_v48 = vshrl.u32 %v389_v37, %v50_v34  ;;  %v53_v49 = vshrl.u32 %v390_v39, %v50_v34  ;;  %v56_v50 = vshrl.u32 %v391_v42, %v50_v34  ;;  %v59_v51 = vshrl.u32 %v392_v44, %v50_v34 }
  0x20   :  { %v249_v52 = vadd.f32 %v248_v41, %v241_v36  ;;  %v62_v53 = vshrl.u32 %v393_v46, %v50_v34  ;;  %v65_v55 = vshrl.u32 %v394_v54, %v50_v34  ;;  %vm67_vm2 = vcmp.lt.s32.totalorder %v48_v30, 1 }
  0x21   :  { %v54_v56 = vor.u32 %v53_v49, %v52_v38  ;;  %v57_v57 = vor.u32 %v56_v50, %v55_v40  ;;  %v60_v58 = vor.u32 %v59_v51, %v58_v43  ;;  %vm68_vm3 = vcmp.lt.s32.totalorder %v48_v30, 2 }
  0x22   :  { %250 = vst [vmem:[#allocation2] sm:$0x1] %v249_v52  ;;  %v63_v59 = vor.u32 %v62_v53, %v61_v45  ;;  %v66_v60 = vor.u32 %v65_v55, %v64_v47  ;;  %vm69_vm4 = vcmp.lt.s32.totalorder %v48_v30, 3  ;;  %vm70_vm5 = vcmp.lt.s32.totalorder %v48_v30, 4 }
  0x23   :  { %v71_v61 = vsel %vm67_vm2, %v51_v48, %v54_v56  ;;  %v72_v62 = vsel %vm70_vm5, %v60_v58, 2102212464  ;;  %v75_v63 = vsel %vm67_vm2, %v54_v56, %v57_v57  ;;  %v79_v0 = vsel %vm67_vm2, %v57_v57, %v60_v58 }
  0x24   :  { %v73_v2 = vsel %vm69_vm4, %v57_v57, %v72_v62  ;;  %v76_v3 = vsel %vm70_vm5, %v63_v59, 920167782  ;;  %v80_v4 = vsel %vm70_vm5, %v66_v60, 1326507024  ;;  %v154_v9 = vshrl.u32 %v389_v37, %v153_v35 }
  0x25   :  { %v77_v7 = vsel %vm69_vm4, %v60_v58, %v76_v3  ;;  %v81_v8 = vsel %vm69_vm4, %v63_v59, %v80_v4  ;;  %v155_v12 = vshll.u32 %v389_v37, %v421_v29  ;;  %v74_v13 = vsel %vm68_vm3, %v71_v61, %v73_v2 }
  0x26   :  { %v78_v14 = vsel %vm68_vm3, %v75_v63, %v77_v7  ;;  %v82_v15 = vsel %vm68_vm3, %v79_v0, %v81_v8  ;;  %v156_v16 = vshrl.u32 %v390_v39, %v153_v35  ;;  %v158_v22 = vshll.u32 %v390_v39, %v421_v29 }
  0x27   :  { %v433_v17 = vmul.u32.u64.low %v423_v32, %v82_v15  ;;  %v434_v18 = vmul.u32.u64.high %v423_v32, %v82_v15, %v433_v17  ;;  %v437_v19 = vmul.u32.u64.low %v423_v32, %v78_v14  ;;  %v438_v20 = vmul.u32.u64.high %v423_v32, %v78_v14, %v437_v19 }
  0x28   :  { %v157_v21 = vor.u32 %v156_v16, %v155_v12  ;;  %v159_v23 = vshrl.u32 %v391_v42, %v153_v35  ;;  %v161_v24 = vshll.u32 %v391_v42, %v421_v29  ;;  %v162_v25 = vshrl.u32 %v392_v44, %v153_v35 }
  0x29   :  { %v164_v26 = vshll.u32 %v392_v44, %v421_v29  ;;  %v165_v27 = vshrl.u32 %v393_v46, %v153_v35  ;;  %v167_v28 = vshll.u32 %v393_v46, %v421_v29  ;;  %v90_v30 = vmul.u32 %v423_v32, %v74_v13 }
  0x2a   :  { %v160_v31 = vor.u32 %v159_v23, %v158_v22  ;;  %v168_v34 = vshrl.u32 %v394_v54, %v153_v35  ;;  %vm170_vm6 = vcmp.lt.s32.totalorder %v151_v1, 1  ;;  %vm92_vm7 = vc.u32 %v434_v18, %v437_v19 }
  0x2b   :  { %v93_v36 = vadd.s32 1, %v438_v20  ;;  %v163_v37 = vor.u32 %v162_v25, %v161_v24  ;;  %vm171_vm8 = vcmp.lt.s32.totalorder %v151_v1, 2  ;;  %v166_v38 = vor.u32 %v165_v27, %v164_v26 }
  0x2c   :  { %v169_v39 = vor.u32 %v168_v34, %v167_v28  ;;  %vm172_vm9 = vcmp.lt.s32.totalorder %v151_v1, 3  ;;  %vm173_vm10 = vcmp.lt.s32.totalorder %v151_v1, 4  ;;  %v174_v41 = vsel %vm170_vm6, %v154_v9, %v157_v21 }
  0x2d   :  { %v94_v40 = vsel %vm92_vm7, %v93_v36, %v438_v20  ;;  %v175_v29 = vsel %vm173_vm10, %v163_v37, 2102212464  ;;  %v178_v32 = vsel %vm170_vm6, %v157_v21, %v160_v31  ;;  %v179_v43 = vsel %vm173_vm10, %v166_v38, 920167782 }
  0x2e   :  { %v95_v42 = vadd.s32 %v94_v40, %v90_v30  ;;  %v176_v35 = vsel %vm172_vm9, %v160_v31, %v175_v29  ;;  %v182_v44 = vsel %vm170_vm6, %v160_v31, %v163_v37  ;;  %v180_v45 = vsel %vm172_vm9, %v163_v37, %v179_v43 }
  0x2f   :  { %v183_v46 = vsel %vm173_vm10, %v169_v39, 1326507024  ;;  %v181_v48 = vsel %vm171_vm8, %v178_v32, %v180_v45  ;;  %v177_v50 = vsel %vm171_vm8, %v174_v41, %v176_v35  ;;  %v91_v8 = vadd.s32 %v437_v19, %v434_v18 }
  0x30   :  { %v96_v47 = vadd.s32 536870912, %v95_v42  ;;  %v184_v49 = vsel %vm172_vm9, %v166_v38, %v183_v46  ;;  %v455_v52 = vmul.u32.u64.low %v425_v33, %v181_v48  ;;  %v456_v53 = vmul.u32.u64.high %v425_v33, %v181_v48, %v455_v52 }
  0x31   :  { %v185_v51 = vsel %vm171_vm8, %v182_v44, %v184_v49  ;;  %v193_v58 = vmul.u32 %v425_v33, %v177_v50  ;;  %vm127_vm6 = vweird.f32 %v409_v5  ;;  %vm230_vm9 = vweird.f32 %v411_v6 }
  0x32   :  { %v458_v54 = vshrl.u32 %v96_v47, 30  ;;  %v461_v55 = vmul.u32.u64.low %v425_v33, %v185_v51  ;;  %v462_v56 = vmul.u32.u64.high %v425_v33, %v185_v51, %v461_v55  ;;  %v196_v59 = vadd.s32 1, %v456_v53 }
  0x34   :  { %v98_v57 = vshll.u32 %v458_v54, 30  ;;  %vm195_vm11 = vc.u32 %v462_v56, %v455_v52  ;;  %v194_v28 = vadd.s32 %v455_v52, %v462_v56  ;;  %v121_v43 = vsub.s32 4, %v458_v54  ;;  %v264_v56 = vld [vmem:[#allocation2] sm:$0x1] }
  0x35   :  { %v197_v61 = vsel %vm195_vm11, %v196_v59, %v456_v53  ;;  %v265_v59 = vmul.f32 0.0625, %v264_v56 }
  0x36   :  { %v99_v60 = vsub.s32 %v95_v42, %v98_v57  ;;  %v198_v63 = vadd.s32 %v197_v61, %v193_v58  ;;  %v122_v47 = vsel %vm37_vm14, %v121_v43, %v458_v54 }
  0x37   :  { %v124_v51 = vsel %vm474_vm15, 0, %v122_v47  ;;  %vm268_vm10 = vcmp.eq.f32.partialorder %v265_v59, inf  ;;  %vm270_vm11 = vcmp.eq.f32.partialorder %v265_v59, 0.0 }
  0x38   :  { %v101_v62 = vsub.s32 0, %v99_v60  ;;  %v199_v1 = vadd.s32 536870912, %v198_v63  ;;  %v128_v55 = vand.u32 3, %v124_v51 }
  0x3a   :  { %v301_v0 = vmin.u32 %v101_v62, %v99_v60  ;;  %v200_v3 = vshrl.u32 %v199_v1, 30  ;;  %vm130_vm2 = vcmp.eq.s32.totalorder %v128_v55, 0  ;;  %vm133_vm3 = vcmp.eq.s32.totalorder %v128_v55, 2 }
  0x3b   :  { %vm129_vm4 = vcmp.lt.s32.totalorder %v128_v55, 2 }
  0x3c   :  { %v103_v2 = vclz %v301_v0  ;;  %v201_v7 = vshll.u32 %v200_v3, 30  ;;  %v224_v49 = vsub.s32 4, %v200_v3 }
  0x3e   :  { %v302_v4 = vadd.s32 4294967294, %v103_v2  ;;  %v202_v33 = vsub.s32 %v198_v63, %v201_v7  ;;  %v225_v52 = vsel %vm140_vm0, %v224_v49, %v200_v3 }
  0x3f   :  { %v227_v57 = vsel %vm487_vm1, 0, %v225_v52 }
  0x40   :  { %vm303_vm12 = vcmp.lt.s32.totalorder %v302_v4, 0  ;;  %v204_v15 = vsub.s32 0, %v202_v33 }
  0x41   :  { %v106_v9 = vsel %vm303_vm12, 0, %v302_v4 }
  0x42   :  { %v107_v12 = vsub.s32 32, %v106_v9  ;;  %v108_v13 = vshll.u32 %v99_v60, %v106_v9  ;;  %v111_v14 = vsub.s32 4294967266, %v106_v9  ;;  %v305_v20 = vmin.u32 %v204_v15, %v202_v33 }
  0x43   :  { %v231_v60 = vand.u32 3, %v227_v57 }
  0x44   :  { %v109_v16 = vshrl.u32 %v91_v8, %v107_v12  ;;  %v112_v17 = vadd.s32 127, %v111_v14  ;;  %v206_v23 = vclz %v305_v20 }
  0x45   :  { %vm236_vm5 = vcmp.eq.s32.totalorder %v231_v60, 2  ;;  %vm233_vm7 = vcmp.eq.s32.totalorder %v231_v60, 0  ;;  %vm232_vm8 = vcmp.lt.s32.totalorder %v231_v60, 2 }
  0x46   :  { %v110_v21 = vor.u32 %v109_v16, %v108_v13  ;;  %v113_v22 = vshll.u32 %v112_v17, 23  ;;  %v306_v26 = vadd.s32 4294967294, %v206_v23 }
  0x48   :  { %v114_v24 = vor.u32 4788187, %v113_v22  ;;  %v117_v25 = vcvt.s32.f32 %v110_v21  ;;  %vm307_vm13 = vcmp.lt.s32.totalorder %v306_v26, 0  ;;  %v251_v21 = vld [vmem:[#allocation3] sm:$0x1]  ;;  %v271_v22 = vand.u32 2147483648, %v265_v59 }
  0x49   :  { %v209_v19 = vsel %vm307_vm13, 0, %v306_v26 }
  0x4a   :  { %v115_v27 = vand.u32 2147483647, %v114_v24  ;;  %v210_v30 = vsub.s32 32, %v209_v19  ;;  %v211_v31 = vshll.u32 %v202_v33, %v209_v19  ;;  %v214_v34 = vsub.s32 4294967266, %v209_v19 }
  0x4c   :  { %v118_v18 = vmul.f32 %v117_v25, %v115_v27  ;;  %v212_v38 = vshrl.u32 %v194_v28, %v210_v30  ;;  %v215_v39 = vadd.s32 127, %v214_v34 }
  0x4e   :  { %v119_v37 = vxor.u32 2147483648, %v118_v18  ;;  %v213_v29 = vor.u32 %v212_v38, %v211_v31  ;;  %v216_v32 = vshll.u32 %v215_v39, 23 }
  0x50   :  { %v120_v40 = vsel %vm37_vm14, %v119_v37, %v118_v18  ;;  %v217_v42 = vor.u32 4788187, %v216_v32  ;;  %v220_v35 = vcvt.s32.f32 %v213_v29 }
  0x51   :  { %v123_v41 = vsel %vm474_vm15, %v409_v5, %v120_v40 }
  0x52   :  { %327 = vcosq.f32 %v123_v41  ;;  %v218_v10 = vand.u32 2147483647, %v217_v42 }
  0x53   :  { %329 = vsinq.f32 %v123_v41 }
  0x54   :  { %v221_v44 = vmul.f32 %v220_v35, %v218_v10 }
  0x56   :  { %v222_v46 = vxor.u32 2147483648, %v221_v44 }
  0x58   :  { %v223_v48 = vsel %vm140_vm0, %v222_v46, %v221_v44 }
  0x59   :  { %v226_v50 = vsel %vm487_vm1, %v411_v6, %v223_v48 }
  0x5a   :  { %331 = vcosq.f32 %v226_v50 }
  0x5b   :  { %333 = vsinq.f32 %v226_v50 }
  0x5c   :  { %335 = vrsqrt.f32 %v265_v59 }
  0x5f   :  { %v328_v11 = vpop.eup %327 }
  0x60   :  { %v330_v53 = vpop.eup %329  ;;  %v134_v58 = vxor.u32 2147483648, %v328_v11 }
  0x61   :  { %v131_v54 = vxor.u32 2147483648, %v330_v53 }
  0x62   :  { %v135_v62 = vsel %vm133_vm3, %v134_v58, %v330_v53 }
  0x63   :  { %v132_v61 = vsel %vm130_vm2, %v328_v11, %v131_v54 }
  0x64   :  { %v136_v1 = vsel %vm129_vm4, %v132_v61, %v135_v62 }
  0x65   :  { %v137_v7 = vsel %vm127_vm6, nan, %v136_v1 }
  0x67   :  { %v332_v63 = vpop.eup %331 }
  0x68   :  { %v334_v0 = vpop.eup %333  ;;  %v237_v2 = vxor.u32 2147483648, %v332_v63 }
  0x69   :  { %v234_v3 = vxor.u32 2147483648, %v334_v0  ;;  %v336_v15 = vpop.eup %335 }
  0x6a   :  { %v238_v4 = vsel %vm236_vm5, %v237_v2, %v334_v0  ;;  %v267_v20 = vmul.f32 %v336_v15, %v265_v59 }
  0x6b   :  { %v235_v8 = vsel %vm233_vm7, %v332_v63, %v234_v3 }
  0x6c   :  { %v239_v9 = vsel %vm232_vm8, %v235_v8, %v238_v4  ;;  %v269_v24 = vsel %vm268_vm10, %v265_v59, %v267_v20 }
  0x6d   :  { %v240_v33 = vsel %vm230_vm9, nan, %v239_v9  ;;  %v272_v25 = vsel %vm270_vm11, %v271_v22, %v269_v24 }
  0x6e   :  { %v252_v12 = vadd.f32 %v240_v33, %v137_v7  ;;  %v273_v26 = vmul.f32 -0.2, %v272_v25 }
  0x70   :  { %v253_v13 = vrot.slane %v252_v12, 4  ;;  %v274_v27 = vmul.f32 1.442695, %v273_v26 }
  0x72   :  { %v254_v14 = vadd.f32 %v253_v13, %v252_v12  ;;  %337 = vpow2.f32 %v274_v27 }
  0x74   :  { %v255_v16 = vrot.slane %v254_v14, 2 }
  0x76   :  { %v256_v17 = vadd.f32 %v255_v16, %v254_v14 }
  0x78   :  { %v257_v5 = vrot.slane %v256_v17, 1 }
  0x7a   :  { %v258_v23 = vadd.f32 %v257_v5, %v256_v17 }
  0x7c   :  { %v259_v6 = vadd.f32 %v258_v23, %v251_v21 }
  0x7e   :  { %260 = vst [vmem:[#allocation3] sm:$0x1] %v259_v6 }
  0x7f   :  { %v338_v30 = vpop.eup %337 }
  0x80   :  { %v276_v34 = vmul.f32 -20.0, %v338_v30 }
  0x85   :  { %v277_v28 = vld [vmem:[#allocation3] sm:$0x1] }
  0x86   :  { %v278_v18 = vmul.f32 0.0625, %v277_v28 }
  0x88   :  { %v279_v19 = vmul.f32 1.442695, %v278_v18 }
  0x8a   :  { %339 = vpow2.f32 %v279_v19 }
  0x97   :  { %v340_v31 = vpop.eup %339 }
  0x98   :  { %v281_v36 = vsub.f32 0.0, %v340_v31 }
  0x9a   :  { %v282_v37 = vadd.f32 %v281_v36, %v276_v34 }
  0x9c   :  { %v283_v38 = vadd.f32 22.718283, %v282_v37 }
  0x9e   :  { %284 = vst [vmem:[#allocation7] sm:$0x1] %v283_v38 }
  0x9f   :  { %372 = shalt.err (!%p369_p9)
}
  0xa0   :  { %294 = dma.vmem_to_hbm [thread:$0]  %s292_s13, 16, %s507_s1, [#allocation6]  }
  0xa1   :  { %383 = dma.done.wait [#allocation6], 16  }
  0xa2   :  { %384 = vsyncadd [#allocation6], 4294967280 }
  0xa3   :  { %298 = vsyncpa [#allocation5], 1 }
  0xa4   :  { %299 = vsyncpa [#allocation6], 1 }

</bundles_post_ra>
